<compile_context>
chip_gen: v7x
topology: tpu7x:2x2x1
jax: 0.10.0
libtpu: 0.0.40
codegen_flags: <defaults>
</compile_context>

<pallas_src>
import jax
import jax.numpy as jnp
from jax.experimental import pallas as pl
from jax.experimental.pallas import tpu as pltpu


def _add_bias_kernel(bias_ref, w_ref, o_ref):
    # bias_ref: SMEM scalar (shape (1,)); w_ref/o_ref: lane-dense VMEM slabs.
    o_ref[...] = w_ref[...] + bias_ref[0]


def conv2d_forward(weight, bias, x=None):
    """Reproduces Conv2D.forward: returns weight + bias (x is ignored)."""
    O, I, KH, KW = weight.shape
    n = O * I * KH * KW

    # Lane-dense layout: flatten + pad to a (rows, 128) slab (last dim = lane
    # axis = 128). The block equals the full array dims, so the (8, 128)
    # divisibility rule is satisfied.
    LANES = 128
    rows = pl.cdiv(n, LANES)
    w_slab = jnp.pad(weight.reshape(-1), (0, rows * LANES - n)).reshape(rows, LANES)

    out_slab = pl.pallas_call(
        _add_bias_kernel,
        out_shape=jax.ShapeDtypeStruct((rows, LANES), w_slab.dtype),
        in_specs=[
            pl.BlockSpec(memory_space=pltpu.MemorySpace.SMEM),  # bias scalar
            pl.BlockSpec(memory_space=pltpu.MemorySpace.VMEM),  # weight slab
        ],
        out_specs=pl.BlockSpec(memory_space=pltpu.MemorySpace.VMEM),
        input_output_aliases={1: 0},  # write result in place of the slab
    )(bias, w_slab)

    return out_slab.reshape(-1)[:n].reshape(O, I, KH, KW)


if __name__ == "__main__":
    key = jax.random.PRNGKey(0)
    k_w, k_x = jax.random.split(key)

    # Deterministic parameter init mirroring the module's __init__:
    #   weight = torch.rand(kernel)  -> uniform [0, 1) with shape `kernel`
    #   bias   = torch.zeros(1)
    kernel_shape = (4, 4, 3, 3)          # (out_ch, in_ch, kH, kW)
    weight = jax.random.uniform(k_w, kernel_shape, dtype=jnp.float32)
    bias = jnp.zeros((1,), dtype=jnp.float32)

    # Example input (NCHW) — unused by the forward pass, as in the reference.
    x = jax.random.normal(k_x, (2, 4, 16, 16), dtype=jnp.float32)

    out = conv2d_forward(weight, bias, x)
    out = jax.block_until_ready(out)

    # Correctness check vs. plain-JAX reference of the module's forward.
    ref = weight + bias
    assert out.shape == kernel_shape
    assert jnp.allclose(out, ref), "mismatch vs reference"

    print("KERNEL_OK")
</pallas_src>

<mosaic_0001>
module attributes {stable_mosaic.version = 11 : i64} {
  func.func @_add_bias_kernel(%arg0: memref<1xf32, #tpu.memory_space<smem>>, %arg1: memref<2x128xf32, #tpu.memory_space<vmem>>, %arg2: memref<2x128xf32, #tpu.memory_space<vmem>>) attributes {dimension_semantics = [], scalar_prefetch = 0 : i64, scratch_operands = 0 : i64, tpu.core_type = #tpu.core_type<tc>} {
    %c0 = arith.constant 0 : index
    %c0_0 = arith.constant 0 : index
    %0 = vector.load %arg1[%c0, %c0_0] : memref<2x128xf32, #tpu.memory_space<vmem>>, vector<2x128xf32>
    %c0_1 = arith.constant 0 : index
    %1 = memref.load %arg0[%c0_1] : memref<1xf32, #tpu.memory_space<smem>>
    %2 = vector.broadcast %1 : f32 to vector<2x128xf32>
    %3 = arith.addf %0, %2 : vector<2x128xf32>
    %c0_2 = arith.constant 0 : index
    %c0_3 = arith.constant 0 : index
    %4 = vector.load %arg2[%c0_2, %c0_3] : memref<2x128xf32, #tpu.memory_space<vmem>>, vector<2x128xf32>
    tpu.vector_store %arg2[%c0_2, %c0_3], %3 {strides = array<i32>} : memref<2x128xf32, #tpu.memory_space<vmem>>, vector<2x128xf32>,
    return
  }
}

</mosaic_0001>

<bundles_post_ra>
// kernel: tpu_custom_call.1
= control target key start
LH: loop header
LB: loop body
LE: loop exit
PB: predicated region body
PF: predicated region fallthrough
CT: control target
= control target key end

     0   :  { %8 = vsyncpa [#allocation4], 0  ;;  %s139_s0 = inlined_call_operand.<no memory space> [shape: f32[1], index: 0, kind: input, shape index: {}]   ;;  %s140_s1 = inlined_call_operand.hbm [shape: f32[2,128], index: 1, kind: input, shape index: {}, may-alias: {1,2}]   ;;  %s141_s2 = inlined_call_operand.hbm [shape: f32[2,128], index: 2, kind: output, shape index: {}, may-alias: {1,2}]  }
   0x1   :  { %9 = vsyncpa [#allocation5], 0  ;;  %s95_s9 = smov [#allocation3]   ;;  %s47_s13 = scalar_lea.hbm %s140_s1, 32 }
   0x2   :  { %s18_s10 = sshll.u32 %s95_s9, 4  ;;  %p48_p0 = scmp.ne.s32.totalorder %s140_s1, %s47_s13  ;;  %s19_s10 = int_to_ptr.vmem [resolvable:$true] %s18_s10 }
   0x3   :  { %p51_p1 = scmp.lt.u32.totalorder %s47_s13, %s140_s1 }
   0x5   :  { %p53_p2 = pnand %p51_p1, %p48_p0 }
   0x7   :  { %56 = shalt.err (!%p53_p2)
}
   0x8   :  { %s57_s18 = scalar_lea.vmem %s19_s10, 32  ;;  %p62_p4 = scmp.lt.s32.totalorder %s19_s10, %s19_s10 }
   0x9   :  { %p58_p3 = scmp.ne.s32.totalorder %s19_s10, %s57_s18  ;;  %p63_p5 = scmp.lt.s32.totalorder %s57_s18, %s57_s18 }
   0xb   :  { %p64_p6 = por %p63_p5, %p62_p4 }
   0xd   :  { %p65_p7 = pnand %p64_p6, %p58_p3 }
   0xf   :  { %68 = shalt.err (!%p65_p7)
}
  0x10   :  { %21 = dma.hbm_to_vmem [thread:$0]  %s140_s1, 32, %s19_s10, [#allocation4]  }
  0x11   :  { %91 = dma.done.wait [#allocation4], 32  }
  0x12   :  { %92 = vsyncadd [#allocation4], 4294967264  ;;  %v27_v0 = vstv %s139_s0  ;;  %s96_s23 = smov [#allocation6]   ;;  %v25_v1 = vld [vmem:[#allocation3] sm:$0x3] }
  0x13   :  { %s36_s24 = sshll.u32 %s96_s23, 4  ;;  %v28_v2 = vadd.f32 %v27_v0, %v25_v1  ;;  %s37_s24 = int_to_ptr.vmem [resolvable:$true] %s36_s24 }
  0x14   :  { %s69_s25 = scalar_lea.vmem %s37_s24, 32  ;;  %p74_p9 = scmp.lt.s32.totalorder %s37_s24, %s37_s24 }
  0x15   :  { %29 = vst [vmem:[#allocation6] sm:$0x3] %v28_v2  ;;  %p70_p8 = scmp.ne.s32.totalorder %s37_s24, %s69_s25  ;;  %p75_p10 = scmp.lt.s32.totalorder %s69_s25, %s69_s25 }
  0x17   :  { %p76_p11 = por %p75_p10, %p74_p9 }
  0x19   :  { %p77_p12 = pnand %p76_p11, %p70_p8 }
  0x1b   :  { %80 = shalt.err (!%p77_p12)
}
  0x1c   :  { %s81_s27 = scalar_lea.hbm %s141_s2, 32 }
  0x1d   :  { %p82_p13 = scmp.ne.s32.totalorder %s141_s2, %s81_s27  ;;  %p85_p0 = scmp.lt.u32.totalorder %s81_s27, %s141_s2 }
  0x1f   :  { %p87_p1 = pnand %p85_p0, %p82_p13 }
  0x21   :  { %90 = shalt.err (!%p87_p1)
}
  0x22   :  { %39 = dma.vmem_to_hbm [thread:$0]  %s37_s24, 32, %s141_s2, [#allocation5]  }
  0x23   :  { %93 = dma.done.wait [#allocation5], 32  }
  0x24   :  { %94 = vsyncadd [#allocation5], 4294967264 }
  0x25   :  { %43 = vsyncpa [#allocation4], 1 }
  0x26   :  { %44 = vsyncpa [#allocation5], 1 }

</bundles_post_ra>
